<compile_context>
chip_gen: v5e
topology: v5e:2x2
jax: 0.10.0
libtpu: 0.0.40
codegen_flags: <defaults>
</compile_context>

<pallas_src>
import numpy as np
import jax
import jax.numpy as jnp
from jax.experimental import pallas as pl
from jax.experimental.pallas import tpu as pltpu

NEG_BIG = 1e30  # additive mask-bias magnitude


def _attention_kernel(self_ref, neigh_ref, mask_ref, a_self_ref, a_neigh_ref,
                      out_ref, m_sc, l_sc, acc_sc):
    j = pl.program_id(1)

    @pl.when(j == 0)
    def _init():
        m_sc[...] = jnp.full_like(m_sc, -NEG_BIG)
        l_sc[...] = jnp.zeros_like(l_sc)
        acc_sc[...] = jnp.zeros_like(acc_sc)

    self_feats = self_ref[...]                        # (TN, Fp) f32
    neigh_feats = neigh_ref[...]                      # (TM, Fp) f32
    mask = mask_ref[...].astype(jnp.float32)          # (TN, TM) {0,1}
    a_self = a_self_ref[...]                          # (1, Fp)
    a_neigh = a_neigh_ref[...]                        # (8, Fp) (row-replicated)

    # logits: cat([self_i, neigh_j]) @ a == <self_i, a[:F]> + <neigh_j, a[F:]>
    # s_self: VPU multiply + XLU lane reduce (no 1-column MXU matvec).
    s_self = jnp.sum(self_feats * a_self, axis=-1, keepdims=True)          # (TN, 1)
    # s_neigh: lane-major (1, TM) row via NT contraction over F (no transpose).
    s_neigh = jax.lax.dot_general(
        a_neigh, neigh_feats, (((1,), (1,)), ((), ())),
        preferred_element_type=jnp.float32)[0:1, :]                        # (1, TM)
    scores = s_self + s_neigh                                              # (TN, TM)

    # LeakyReLU(negative_slope=0.2), matching nn.LeakyReLU(0.2) in the module.
    scores = jnp.where(scores >= 0, scores, 0.2 * scores)

    # Additive mask bias: one FMA per element (masked entries -> ~ -1e30).
    scores = scores + (mask - 1.0) * NEG_BIG

    # Online (flash-style) masked softmax over the neighbor axis.
    m_prev = m_sc[...]
    m_new = jnp.maximum(m_prev, jnp.max(scores, axis=-1, keepdims=True))   # (TN, 1)
    alpha = jnp.exp(m_prev - m_new)
    # `* mask` is load-bearing: rows with zero neighbors must keep p == 0.
    p = jnp.exp(scores - m_new) * mask                                     # (TN, TM)
    l_sc[...] = alpha * l_sc[...] + jnp.sum(p, axis=-1, keepdims=True)
    acc_sc[...] = alpha * acc_sc[...] + jnp.dot(
        p, neigh_feats, preferred_element_type=jnp.float32)
    m_sc[...] = m_new

    @pl.when(j == pl.num_programs(1) - 1)
    def _finalize():
        denom = l_sc[...]
        inv = jnp.where(denom > 0, pl.reciprocal(denom, approx=True), 0.0)
        out_ref[...] = (acc_sc[...] * inv).astype(out_ref.dtype)


def _round_up(x, m):
    return (x + m - 1) // m * m


def attention_aggregator(self_feats, features_neighs, neigh_matrix, a,
                         *, tile_n=32, tile_m=128):
    """out[i] = sum_j softmax_j(leaky_relu([self_i|neigh_j] @ a)) * neigh_j over
    the neighbors selected by neigh_matrix[i]."""
    N, F = self_feats.shape
    M = features_neighs.shape[0]

    # Lane-dense padding: F -> 128 multiple, M -> tile_m multiple, N -> tile_n
    # multiple (tile_n=32 keeps the int8 mask block on a native (32,128) tile).
    Fp = _round_up(F, 128)
    Mp = _round_up(M, tile_m)
    Np = _round_up(N, tile_n)

    f32 = jnp.float32
    sf = jnp.zeros((Np, Fp), f32).at[:N, :F].set(self_feats.astype(f32))
    nf = jnp.zeros((Mp, Fp), f32).at[:M, :F].set(features_neighs.astype(f32))
    mk = jnp.zeros((Np, Mp), jnp.int8).at[:N, :M].set(
        (neigh_matrix != 0).astype(jnp.int8))
    a_self = jnp.zeros((1, Fp), f32).at[0, :F].set(a[:F, 0].astype(f32))
    # Replicate a_neigh over 8 sublanes so the NT dot has an aligned LHS.
    a_neigh = jnp.zeros((8, Fp), f32).at[:, :F].set(
        jnp.broadcast_to(a[F:, 0].astype(f32), (8, F)))

    grid = (Np // tile_n, Mp // tile_m)
    out = pl.pallas_call(
        _attention_kernel,
        out_shape=jax.ShapeDtypeStruct((Np, Fp), f32),
        grid_spec=pltpu.PrefetchScalarGridSpec(
            num_scalar_prefetch=0,
            grid=grid,
            in_specs=[
                pl.BlockSpec((tile_n, Fp), lambda i, j: (i, 0)),      # self feats
                pl.BlockSpec((tile_m, Fp), lambda i, j: (j, 0)),      # neigh feats
                pl.BlockSpec((tile_n, tile_m), lambda i, j: (i, j)),  # int8 mask
                pl.BlockSpec((1, Fp), lambda i, j: (0, 0)),           # a_self row
                pl.BlockSpec((8, Fp), lambda i, j: (0, 0)),           # a_neigh rows
            ],
            out_specs=pl.BlockSpec((tile_n, Fp), lambda i, j: (i, 0)),
            scratch_shapes=[
                pltpu.VMEM((tile_n, 1), f32),    # running max
                pltpu.VMEM((tile_n, 1), f32),    # running denom
                pltpu.VMEM((tile_n, Fp), f32),   # running accumulator
            ],
        ),
        compiler_params=pltpu.CompilerParams(
            dimension_semantics=("parallel", "arbitrary"),
            vmem_limit_bytes=48 * 1024 * 1024,   # stays inside v7x's 64 MiB VMEM
        ),
    )(sf, nf, mk, a_self, a_neigh)
    return out[:N, :F]


def _reference(self_feats, features_neighs, neigh_matrix, a):
    # Pure-numpy replica of the PyTorch per-node loop, for validation.
    sf, fn, nm, av = (np.asarray(x, np.float32) for x in
                      (self_feats, features_neighs, neigh_matrix, a))
    N, F = sf.shape
    out = np.zeros((N, F), np.float32)
    for i in range(N):
        feat = fn[nm[i] > 0]
        if feat.shape[0] == 0:
            continue
        cat = np.concatenate([np.broadcast_to(sf[i], feat.shape), feat], axis=1)
        att = cat @ av
        att = np.where(att >= 0, att, 0.2 * att)
        att = np.exp(att - att.max(axis=0, keepdims=True))
        att = att / att.sum(axis=0, keepdims=True)
        out[i] = (feat * att).sum(axis=0)
    return out


if __name__ == "__main__":
    root = jax.random.PRNGKey(0)
    case_keys = jax.random.split(root, 2)

    def run_case(key, N, M, F):
        k1, k2, k3, k4 = jax.random.split(key, 4)
        self_feats = jax.random.normal(k1, (N, F), dtype=jnp.float32)
        features_neighs = jax.random.normal(k2, (M, F), dtype=jnp.float32)
        neigh_matrix = (jax.random.uniform(k3, (N, M)) > 0.5).astype(jnp.float32)
        neigh_matrix = neigh_matrix.at[0].set(0.0)  # exercise zero-neighbor guard
        # nn.init.xavier_uniform_ on (2F, 1): bound = sqrt(6 / (2F + 1))
        bound = float(np.sqrt(6.0 / (2 * F + 1)))
        a = jax.random.uniform(k4, (2 * F, 1), minval=-bound, maxval=bound,
                               dtype=jnp.float32)

        out = attention_aggregator(self_feats, features_neighs, neigh_matrix, a)
        out = jax.block_until_ready(out)
        ref = _reference(self_feats, features_neighs, neigh_matrix, a)
        # Tolerance accommodates the approximate EUP reciprocal.
        np.testing.assert_allclose(np.asarray(out), ref, atol=2e-3, rtol=2e-3)

    run_case(case_keys[0], N=8, M=16, F=32)    # module-scale toy shapes
    run_case(case_keys[1], N=12, M=20, F=48)   # uneven shapes exercise padding
    print("KERNEL_OK")
</pallas_src>

<mosaic_0001>
module attributes {stable_mosaic.version = 11 : i64} {
  func.func @_attention_kernel(%arg0: i32, %arg1: i32, %arg2: memref<32x128xf32, #tpu.memory_space<vmem>>, %arg3: memref<128x128xf32, #tpu.memory_space<vmem>>, %arg4: memref<32x128xi8, #tpu.memory_space<vmem>>, %arg5: memref<1x128xf32, #tpu.memory_space<vmem>>, %arg6: memref<8x128xf32, #tpu.memory_space<vmem>>, %arg7: memref<32x128xf32, #tpu.memory_space<vmem>>, %arg8: memref<32x1xf32, #tpu.memory_space<vmem>>, %arg9: memref<32x1xf32, #tpu.memory_space<vmem>>, %arg10: memref<32x128xf32, #tpu.memory_space<vmem>>) attributes {dimension_semantics = [#tpu.dimension_semantics<parallel>, #tpu.dimension_semantics<arbitrary>], iteration_bounds = array<i64: 1, 1>, scalar_prefetch = 0 : i64, scratch_operands = 3 : i64, tpu.core_type = #tpu.core_type<tc>, window_params = [{transform_indices = @transform_0, window_bounds = array<i64: 32, 128>}, {transform_indices = @transform_1, window_bounds = array<i64: 128, 128>}, {transform_indices = @transform_2, window_bounds = array<i64: 32, 128>}, {pipeline_mode = #tpu.pipeline_mode<synchronous>, transform_indices = @transform_3, window_bounds = array<i64: 1, 128>}, {pipeline_mode = #tpu.pipeline_mode<synchronous>, transform_indices = @transform_4, window_bounds = array<i64: 8, 128>}, {transform_indices = @transform_5, window_bounds = array<i64: 32, 128>}]} {
    %c0_i32 = arith.constant 0 : i32
    %0 = arith.cmpi eq, %arg1, %c0_i32 : i32
    %1 = arith.extui %0 : i1 to i32
    %c0_i32_0 = arith.constant 0 : i32
    %2 = arith.cmpi ne, %1, %c0_i32_0 : i32
    scf.if %2 {
      %cst_32 = arith.constant -1.000000e+30 : f32
      %54 = vector.broadcast %cst_32 : f32 to vector<32x1xf32>
      %c0_33 = arith.constant 0 : index
      %c0_34 = arith.constant 0 : index
      %55 = vector.load %arg8[%c0_33, %c0_34] : memref<32x1xf32, #tpu.memory_space<vmem>>, vector<32x1xf32>
      tpu.vector_store %arg8[%c0_33, %c0_34], %54 {strides = array<i32>} : memref<32x1xf32, #tpu.memory_space<vmem>>, vector<32x1xf32>,
      %cst_35 = arith.constant 0.000000e+00 : f32
      %56 = vector.broadcast %cst_35 : f32 to vector<32x1xf32>
      %c0_36 = arith.constant 0 : index
      %c0_37 = arith.constant 0 : index
      %57 = vector.load %arg9[%c0_36, %c0_37] : memref<32x1xf32, #tpu.memory_space<vmem>>, vector<32x1xf32>
      tpu.vector_store %arg9[%c0_36, %c0_37], %56 {strides = array<i32>} : memref<32x1xf32, #tpu.memory_space<vmem>>, vector<32x1xf32>,
      %cst_38 = arith.constant 0.000000e+00 : f32
      %58 = vector.broadcast %cst_38 : f32 to vector<32x128xf32>
      %c0_39 = arith.constant 0 : index
      %c0_40 = arith.constant 0 : index
      %59 = vector.load %arg10[%c0_39, %c0_40] : memref<32x128xf32, #tpu.memory_space<vmem>>, vector<32x128xf32>
      tpu.vector_store %arg10[%c0_39, %c0_40], %58 {strides = array<i32>} : memref<32x128xf32, #tpu.memory_space<vmem>>, vector<32x128xf32>,
    } else {
    }
    %c0 = arith.constant 0 : index
    %c0_1 = arith.constant 0 : index
    %3 = vector.load %arg2[%c0, %c0_1] : memref<32x128xf32, #tpu.memory_space<vmem>>, vector<32x128xf32>
    %c0_2 = arith.constant 0 : index
    %c0_3 = arith.constant 0 : index
    %4 = vector.load %arg3[%c0_2, %c0_3] : memref<128x128xf32, #tpu.memory_space<vmem>>, vector<128x128xf32>
    %c0_4 = arith.constant 0 : index
    %c0_5 = arith.constant 0 : index
    %5 = vector.load %arg4[%c0_4, %c0_5] : memref<32x128xi8, #tpu.memory_space<vmem>>, vector<32x128xi8>
    %6 = arith.sitofp %5 : vector<32x128xi8> to vector<32x128xf32>
    %c0_6 = arith.constant 0 : index
    %c0_7 = arith.constant 0 : index
    %7 = vector.load %arg5[%c0_6, %c0_7] : memref<1x128xf32, #tpu.memory_space<vmem>>, vector<1x128xf32>
    %c0_8 = arith.constant 0 : index
    %c0_9 = arith.constant 0 : index
    %8 = vector.load %arg6[%c0_8, %c0_9] : memref<8x128xf32, #tpu.memory_space<vmem>>, vector<8x128xf32>
    %9 = vector.broadcast %7 : vector<1x128xf32> to vector<32x128xf32>
    %10 = arith.mulf %3, %9 : vector<32x128xf32>
    %cst = arith.constant dense<0.000000e+00> : vector<32xf32>
    %11 = vector.multi_reduction <add>, %10, %cst [1] : vector<32x128xf32> to vector<32xf32>
    %12 = vector.shape_cast %11 : vector<32xf32> to vector<32x1xf32>
    %cst_10 = arith.constant dense<0.000000e+00> : vector<8x128xf32>
    %13 = tpu.matmul %8, %4, %cst_10 {dimension_numbers = #tpu.dot_dimension_numbers<[1], [1], [0], [0], [0, 0, 1, 0], [], []>} : vector<8x128xf32>, vector<128x128xf32>, vector<8x128xf32> -> vector<8x128xf32>
    %14 = vector.extract_strided_slice %13 {offsets = [0, 0], sizes = [1, 128], strides = [1, 1]} : vector<8x128xf32> to vector<1x128xf32>
    %15 = vector.broadcast %12 : vector<32x1xf32> to vector<32x128xf32>
    %16 = vector.broadcast %14 : vector<1x128xf32> to vector<32x128xf32>
    %17 = arith.addf %15, %16 : vector<32x128xf32>
    %cst_11 = arith.constant 0.000000e+00 : f32
    %18 = vector.broadcast %cst_11 : f32 to vector<32x128xf32>
    %19 = arith.cmpf oge, %17, %18 : vector<32x128xf32>
    %cst_12 = arith.constant 2.000000e-01 : f32
    %20 = vector.broadcast %cst_12 : f32 to vector<32x128xf32>
    %21 = arith.mulf %20, %17 : vector<32x128xf32>
    %22 = arith.select %19, %17, %21 : vector<32x128xi1>, vector<32x128xf32>
    %cst_13 = arith.constant 1.000000e+00 : f32
    %23 = vector.broadcast %cst_13 : f32 to vector<32x128xf32>
    %24 = arith.subf %6, %23 : vector<32x128xf32>
    %cst_14 = arith.constant 1.000000e+30 : f32
    %25 = vector.broadcast %cst_14 : f32 to vector<32x128xf32>
    %26 = arith.mulf %24, %25 : vector<32x128xf32>
    %27 = arith.addf %22, %26 : vector<32x128xf32>
    %c0_15 = arith.constant 0 : index
    %c0_16 = arith.constant 0 : index
    %28 = vector.load %arg8[%c0_15, %c0_16] : memref<32x1xf32, #tpu.memory_space<vmem>>, vector<32x1xf32>
    %cst_17 = arith.constant dense<0xFF800000> : vector<32xf32>
    %29 = vector.multi_reduction <maximumf>, %27, %cst_17 [1] : vector<32x128xf32> to vector<32xf32>
    %30 = vector.shape_cast %29 : vector<32xf32> to vector<32x1xf32>
    %31 = arith.maximumf %28, %30 : vector<32x1xf32>
    %32 = arith.subf %28, %31 : vector<32x1xf32>
    %33 = math.exp %32 : vector<32x1xf32>
    %34 = vector.broadcast %31 : vector<32x1xf32> to vector<32x128xf32>
    %35 = arith.subf %27, %34 : vector<32x128xf32>
    %36 = math.exp %35 : vector<32x128xf32>
    %37 = arith.mulf %36, %6 : vector<32x128xf32>
    %c0_18 = arith.constant 0 : index
    %c0_19 = arith.constant 0 : index
    %38 = vector.load %arg9[%c0_18, %c0_19] : memref<32x1xf32, #tpu.memory_space<vmem>>, vector<32x1xf32>
    %39 = arith.mulf %33, %38 : vector<32x1xf32>
    %cst_20 = arith.constant dense<0.000000e+00> : vector<32xf32>
    %40 = vector.multi_reduction <add>, %37, %cst_20 [1] : vector<32x128xf32> to vector<32xf32>
    %41 = vector.shape_cast %40 : vector<32xf32> to vector<32x1xf32>
    %42 = arith.addf %39, %41 : vector<32x1xf32>
    %c0_21 = arith.constant 0 : index
    %c0_22 = arith.constant 0 : index
    %43 = vector.load %arg9[%c0_21, %c0_22] : memref<32x1xf32, #tpu.memory_space<vmem>>, vector<32x1xf32>
    tpu.vector_store %arg9[%c0_21, %c0_22], %42 {strides = array<i32>} : memref<32x1xf32, #tpu.memory_space<vmem>>, vector<32x1xf32>,
    %c0_23 = arith.constant 0 : index
    %c0_24 = arith.constant 0 : index
    %44 = vector.load %arg10[%c0_23, %c0_24] : memref<32x128xf32, #tpu.memory_space<vmem>>, vector<32x128xf32>
    %45 = vector.broadcast %33 : vector<32x1xf32> to vector<32x128xf32>
    %46 = arith.mulf %45, %44 : vector<32x128xf32>
    %cst_25 = arith.constant dense<0.000000e+00> : vector<32x128xf32>
    %47 = tpu.matmul %37, %4, %cst_25 {dimension_numbers = #tpu.dot_dimension_numbers<[1], [0], [0], [1], [0, 0, 1, 1], [], []>} : vector<32x128xf32>, vector<128x128xf32>, vector<32x128xf32> -> vector<32x128xf32>
    %48 = arith.addf %46, %47 : vector<32x128xf32>
    %c0_26 = arith.constant 0 : index
    %c0_27 = arith.constant 0 : index
    %49 = vector.load %arg10[%c0_26, %c0_27] : memref<32x128xf32, #tpu.memory_space<vmem>>, vector<32x128xf32>
    tpu.vector_store %arg10[%c0_26, %c0_27], %48 {strides = array<i32>} : memref<32x128xf32, #tpu.memory_space<vmem>>, vector<32x128xf32>,
    %c0_28 = arith.constant 0 : index
    %c0_29 = arith.constant 0 : index
    %50 = vector.load %arg8[%c0_28, %c0_29] : memref<32x1xf32, #tpu.memory_space<vmem>>, vector<32x1xf32>
    tpu.vector_store %arg8[%c0_28, %c0_29], %31 {strides = array<i32>} : memref<32x1xf32, #tpu.memory_space<vmem>>, vector<32x1xf32>,
    %c0_i32_30 = arith.constant 0 : i32
    %51 = arith.cmpi eq, %arg1, %c0_i32_30 : i32
    %52 = arith.extui %51 : i1 to i32
    %c0_i32_31 = arith.constant 0 : i32
    %53 = arith.cmpi ne, %52, %c0_i32_31 : i32
    scf.if %53 {
      %c0_32 = arith.constant 0 : index
      %c0_33 = arith.constant 0 : index
      %54 = vector.load %arg9[%c0_32, %c0_33] : memref<32x1xf32, #tpu.memory_space<vmem>>, vector<32x1xf32>
      %cst_34 = arith.constant 0.000000e+00 : f32
      %55 = vector.broadcast %cst_34 : f32 to vector<32x1xf32>
      %56 = arith.cmpf ogt, %54, %55 : vector<32x1xf32>
      %57 = tpu.reciprocal %54 {approx = true} : vector<32x1xf32> -> vector<32x1xf32>
      %cst_35 = arith.constant 0.000000e+00 : f32
      %58 = vector.broadcast %cst_35 : f32 to vector<32x1xf32>
      %59 = arith.select %56, %57, %58 : vector<32x1xi1>, vector<32x1xf32>
      %c0_36 = arith.constant 0 : index
      %c0_37 = arith.constant 0 : index
      %60 = vector.load %arg10[%c0_36, %c0_37] : memref<32x128xf32, #tpu.memory_space<vmem>>, vector<32x128xf32>
      %61 = vector.broadcast %59 : vector<32x1xf32> to vector<32x128xf32>
      %62 = arith.mulf %60, %61 : vector<32x128xf32>
      %c0_38 = arith.constant 0 : index
      %c0_39 = arith.constant 0 : index
      %63 = vector.load %arg7[%c0_38, %c0_39] : memref<32x128xf32, #tpu.memory_space<vmem>>, vector<32x128xf32>
      tpu.vector_store %arg7[%c0_38, %c0_39], %62 {strides = array<i32>} : memref<32x128xf32, #tpu.memory_space<vmem>>, vector<32x128xf32>,
    } else {
    }
    return
  }
  func.func @transform_0(%arg0: i32, %arg1: i32) -> (i32, i32) {
    %c0_i32 = arith.constant 0 : i32
    %c0_i32_0 = arith.constant 0 : i32
    return %arg0, %c0_i32 : i32, i32
  }
  func.func @transform_1(%arg0: i32, %arg1: i32) -> (i32, i32) {
    %c0_i32 = arith.constant 0 : i32
    %c0_i32_0 = arith.constant 0 : i32
    return %arg1, %c0_i32 : i32, i32
  }
  func.func @transform_2(%arg0: i32, %arg1: i32) -> (i32, i32) {
    %c0_i32 = arith.constant 0 : i32
    return %arg0, %arg1 : i32, i32
  }
  func.func @transform_3(%arg0: i32, %arg1: i32) -> (i32, i32) {
    %c0_i32 = arith.constant 0 : i32
    %c0_i32_0 = arith.constant 0 : i32
    %c0_i32_1 = arith.constant 0 : i32
    return %c0_i32, %c0_i32_0 : i32, i32
  }
  func.func @transform_4(%arg0: i32, %arg1: i32) -> (i32, i32) {
    %c0_i32 = arith.constant 0 : i32
    %c0_i32_0 = arith.constant 0 : i32
    %c0_i32_1 = arith.constant 0 : i32
    return %c0_i32, %c0_i32_0 : i32, i32
  }
  func.func @transform_5(%arg0: i32, %arg1: i32) -> (i32, i32) {
    %c0_i32 = arith.constant 0 : i32
    %c0_i32_0 = arith.constant 0 : i32
    return %arg0, %c0_i32 : i32, i32
  }
}

</mosaic_0001>

<bundles_post_ra>
// kernel: tpu_custom_call.1
= control target key start
LH: loop header
LB: loop body
LE: loop exit
PB: predicated region body
PF: predicated region fallthrough
CT: control target
= control target key end

     0   :  { %10 = vsyncpa [#allocation6], 0  ;;  %s695_s0 = inlined_call_operand.hbm [shape: f32[32,128], index: 0, kind: input, shape index: {}]   ;;  %s696_s1 = inlined_call_operand.hbm [shape: f32[128,128], index: 1, kind: input, shape index: {}]   ;;  %s697_s2 = inlined_call_operand.hbm [shape: s8[32,128], index: 2, kind: input, shape index: {}]   ;;  %s698_s3 = inlined_call_operand.vmem [shape: f32[1,128], index: 3, kind: input, shape index: {}]   ;;  %s699_s4 = inlined_call_operand.hbm [shape: f32[8,128], index: 4, kind: input, shape index: {}]   ;;  %s700_s5 = inlined_call_operand.hbm [shape: f32[32,128], index: 5, kind: output, shape index: {}]  }
   0x1   :  { %11 = vsyncpa [#allocation9], 0 }
   0x2   :  { %12 = vsyncpa [#allocation12], 0 }
   0x3   :  { %13 = vsyncpa [#allocation7], 0  ;;  %s31_s20 = sshll.u32 %s696_s1, 4  ;;  %s592_s21 = smov [#allocation8]   ;;  %s32_s20 = int_to_ptr.hbm [resolvable:$true] %s31_s20 }
   0x4   :  { %s33_s22 = sshll.u32 %s592_s21, 4  ;;  %s18_s25 = sshll.u32 %s695_s0, 4  ;;  %s34_s22 = int_to_ptr.vmem [resolvable:$true] %s33_s22  ;;  %s19_s25 = int_to_ptr.hbm [resolvable:$true] %s18_s25 }
   0x5   :  { %s593_s26 = smov 128   ;;  %s594_s27 = smov 8  }
   0x6   :  { %39 = dma.hbm_to_vmem [thread:$0]  %s32_s20, 2048, %s34_s22, [#allocation9], %s593_s26, %s593_s26, %s594_s27  }
   0x7   :  { %s595_s28 = smov [#allocation5]   ;;  %s45_s1 = sshll.u32 %s697_s2, 4  ;;  %s46_s1 = int_to_ptr.hbm [resolvable:$true] %s45_s1 }
   0x8   :  { %s20_s29 = sshll.u32 %s595_s28, 4  ;;  %s58_s8 = sshll.u32 %s699_s4, 4  ;;  %s21_s29 = int_to_ptr.vmem [resolvable:$true] %s20_s29  ;;  %s59_s8 = int_to_ptr.hbm [resolvable:$true] %s58_s8 }
   0x9   :  { %26 = dma.hbm_to_vmem [thread:$0]  %s19_s25, 512, %s21_s29, [#allocation6], %s593_s26, %s593_s26, %s594_s27  }
   0xa   :  { %s596_s9 = smov [#allocation10]   ;;  %s597_s11 = smov [#allocation11]  }
   0xb   :  { %s47_s10 = sshll.u32 %s596_s9, 4  ;;  %s60_s12 = sshll.u32 %s597_s11, 4  ;;  %s48_s10 = int_to_ptr.vmem [resolvable:$true] %s47_s10  ;;  %s61_s12 = int_to_ptr.vmem [resolvable:$true] %s60_s12 }
   0xc   :  { %50 = dma.hbm_to_vmem [thread:$0]  %s46_s1, 128, %s48_s10, [#allocation9]  }
   0xd   :  { %63 = dma.hbm_to_vmem [thread:$0]  %s59_s8, 128, %s61_s12, [#allocation12]  }
   0xe   :  { %584 = dma.done.wait [#allocation6], 512  }
   0xf   :  { %585 = vsyncadd [#allocation6], 4294966784 }
  0x10   :  { %586 = dma.done.wait [#allocation9], 2176  }
  0x11   :  { %587 = vsyncadd [#allocation9], 4294965120 }
  0x12   :  { %588 = dma.done.wait [#allocation12], 128  }
  0x13   :  { %589 = vsyncadd [#allocation12], 4294967168  ;;  %v116_v0 = vld [vmem:[#allocation8 + $0x78] sm:$0xff]  ;;  %v115_v1 = vld [vmem:[#allocation8 + $0x70] sm:$0xff]  ;;  %vm84_vm0 = vcmask 7168   ;;  %s407_s16 = sshll.u32 %s700_s5, 4  ;;  %s408_s16 = int_to_ptr.hbm [resolvable:$true] %s407_s16 }
  0x14   :  { %143 = vmatpush.xpose.msra.mxu0 %v116_v0  ;;  %309 = vmatpush.msra.mxu1 %v116_v0  ;;  %v114_v2 = vld [vmem:[#allocation8 + $0x68] sm:$0xff]  ;;  %v113_v3 = vld [vmem:[#allocation8 + $0x60] sm:$0xff]  ;;  %v112_v4 = vld [vmem:[#allocation8 + $0x58] sm:$0xff]  ;;  %v598_v26 = vmov -1e+30  }
  0x15   :  { %v111_v5 = vld [vmem:[#allocation8 + $0x50] sm:$0xff]  ;;  %v110_v6 = vld [vmem:[#allocation8 + $0x48] sm:$0xff]  ;;  %v109_v7 = vld [vmem:[#allocation8 + $0x40] sm:$0xff]  ;;  %88 = vst.msk [vmem:[#allocation2 + $0x18] sm:$0xff] %vm84_vm0, %v598_v26 }
  0x16   :  { %310 = vmatpush.msra.mxu1 %v115_v1  ;;  %v108_v8 = vld [vmem:[#allocation8 + $0x38] sm:$0xff]  ;;  %v107_v9 = vld [vmem:[#allocation8 + $0x30] sm:$0xff]  ;;  %v106_v10 = vld [vmem:[#allocation8 + $0x28] sm:$0xff]  ;;  %85 = vst.msk [vmem:[#allocation2] sm:$0xff] %vm84_vm0, %v598_v26 }
  0x17   :  { %v105_v11 = vld [vmem:[#allocation8 + $0x20] sm:$0xff]  ;;  %v104_v12 = vld [vmem:[#allocation8 + $0x18] sm:$0xff]  ;;  %v103_v13 = vld [vmem:[#allocation8 + $0x10] sm:$0xff]  ;;  %86 = vst.msk [vmem:[#allocation2 + $0x8] sm:$0xff] %vm84_vm0, %v598_v26 }
  0x18   :  { %144 = vmatpush.xpose.msra.mxu0 %v115_v1  ;;  %311 = vmatpush.msra.mxu1 %v114_v2  ;;  %v102_v14 = vld [vmem:[#allocation8 + $0x8] sm:$0xff]  ;;  %v101_v15 = vld [vmem:[#allocation8] sm:$0xff]  ;;  %v99_v16 = vld [vmem:[#allocation5 + $0x10] sm:$0xff]  ;;  %87 = vst.msk [vmem:[#allocation2 + $0x10] sm:$0xff] %vm84_vm0, %v598_v26 }
  0x19   :  { %v439_v17 = vld [vmem:[%s698_s3] ss:$0 sm:$0xff]  ;;  %v100_v21 = vld [vmem:[#allocation5 + $0x18] sm:$0xff]  ;;  %v98_v22 = vld [vmem:[#allocation5 + $0x8] sm:$0xff]  ;;  %s601_s3 = smov [#allocation13]  }
  0x1a   :  { %312 = vmatpush.msra.mxu1 %v113_v3  ;;  %v97_v18 = vld [vmem:[#allocation5] sm:$0xff]  ;;  %v133_v19 = vmul.f32 %v439_v17, %v99_v16  ;;  %v134_v23 = vmul.f32 %v439_v17, %v100_v21  ;;  %v132_v24 = vmul.f32 %v439_v17, %v98_v22  ;;  %v127_v25 = vld [vmem:[#allocation11] sm:$0xff]  ;;  %s405_s13 = sshll.u32 %s601_s3, 4  ;;  %s406_s13 = int_to_ptr.vmem [resolvable:$true] %s405_s13 }
  0x1b   :  { %v131_v20 = vmul.f32 %v439_v17, %v97_v18  ;;  %v117_v27 = vld [vmem:[#allocation10] sm:$0xff] }
  0x1c   :  { %145 = vmatpush.xpose.msra.mxu0 %v114_v2  ;;  %313 = vmatpush.msra.mxu1 %v112_v4  ;;  %v121_v29 = vunpack.c.3.s8 %v117_v27  ;;  %v120_v30 = vunpack.c.2.s8 %v117_v27  ;;  %v118_v32 = vunpack.c.0.s8 %v117_v27  ;;  %v119_v40 = vunpack.c.1.s8 %v117_v27 }
  0x1d   :  { %139 = vadd.xlane.f32.xlu1 %v133_v19  ;;  %135 = vadd.xlane.f32.xlu0 %v131_v20  ;;  %v599_v2 = vmov 0  }
  0x1e   :  { %314 = vmatpush.msra.mxu1 %v111_v5  ;;  %v657_v33 = vcvt.s32.f32 %v121_v29  ;;  %v659_v34 = vcvt.s32.f32 %v120_v30  ;;  %v661_v35 = vcvt.s32.f32 %v118_v32  ;;  %v666_v49 = vcvt.s32.f32 %v119_v40  ;;  %438 = vset.pattern.permute.xlu1 %v599_v2  ;;  %v193_v16 = vld [vmem:[#allocation2 + $0x8] sm:$0xff] }
  0x1f   :  { %436 = vset.pattern.permute.xlu2 %v599_v2  ;;  %437 = vset.pattern.permute.xlu0 %v599_v2 }
  0x20   :  { %146 = vmatpush.xpose.msra.mxu0 %v113_v3  ;;  %315 = vmatpush.msra.mxu1 %v110_v6  ;;  %v425_v38 = vadd.f32 -1.0, %v657_v33  ;;  %v424_v39 = vadd.f32 -1.0, %v659_v34  ;;  %v422_v42 = vadd.f32 -1.0, %v661_v35  ;;  %v423_v61 = vadd.f32 -1.0, %v666_v49 }
  0x21   :  { %v600_v3 = vmov 0.0  }
  0x22   :  { %316 = vmatpush.msra.mxu1 %v109_v7  ;;  %v187_v47 = vmul.f32 1e+30, %v425_v38  ;;  %v186_v48 = vmul.f32 1e+30, %v424_v39  ;;  %v184_v51 = vmul.f32 1e+30, %v422_v42 }
  0x23   :  { %v185_v63 = vmul.f32 1e+30, %v423_v61  ;;  %89 = vst.msk [vmem:[#allocation3] sm:$0xff] %vm84_vm0, %v600_v3 }
  0x24   :  { %147 = vmatpush.xpose.msra.mxu0 %v112_v4  ;;  %317 = vmatpush.msra.mxu1 %v108_v8  ;;  %90 = vst.msk [vmem:[#allocation3 + $0x8] sm:$0xff] %vm84_vm0, %v600_v3  ;;  %v673_v4 = vld [vmem:[#allocation2 + $0x18] sm:$0xff] }
  0x25   :  { %141 = vadd.xlane.f32.xlu1 %v134_v23  ;;  %137 = vadd.xlane.f32.xlu0 %v132_v24  ;;  %91 = vst.msk [vmem:[#allocation3 + $0x10] sm:$0xff] %vm84_vm0, %v600_v3 }
  0x26   :  { %318 = vmatpush.msra.mxu1 %v107_v9  ;;  %92 = vst.msk [vmem:[#allocation3 + $0x18] sm:$0xff] %vm84_vm0, %v600_v3 }
  0x28   :  { %148 = vmatpush.xpose.msra.mxu0 %v111_v5  ;;  %319 = vmatpush.msra.mxu1 %v106_v10  ;;  %v192_v5 = vld [vmem:[#allocation2] sm:$0xff] }
  0x2a   :  { %320 = vmatpush.msra.mxu1 %v105_v11 }
  0x2b   :  { %v257_v2 = vld [vmem:[#allocation3 + $0x8] sm:$0xff] }
  0x2c   :  { %149 = vmatpush.xpose.msra.mxu0 %v110_v6  ;;  %321 = vmatpush.msra.mxu1 %v104_v12  ;;  %v194_v6 = vld [vmem:[#allocation2 + $0x10] sm:$0xff] }
  0x2e   :  { %322 = vmatpush.msra.mxu1 %v103_v13 }
  0x30   :  { %150 = vmatpush.xpose.msra.mxu0 %v109_v7  ;;  %323 = vmatpush.msra.mxu1 %v102_v14 }
  0x32   :  { %324 = vmatpush.msra.mxu1 %v101_v15 }
  0x34   :  { %151 = vmatpush.xpose.msra.mxu0 %v108_v8 }
  0x38   :  { %152 = vmatpush.xpose.msra.mxu0 %v107_v9 }
  0x3c   :  { %153 = vmatpush.xpose.msra.mxu0 %v106_v10 }
  0x40   :  { %154 = vmatpush.xpose.msra.mxu0 %v105_v11 }
  0x44   :  { %155 = vmatpush.xpose.msra.mxu0 %v104_v12 }
  0x48   :  { %156 = vmatpush.xpose.msra.mxu0 %v103_v13 }
  0x4c   :  { %157 = vmatpush.xpose.msra.mxu0 %v102_v14 }
  0x50   :  { %158 = vmatpush.xpose.msra.mxu0 %v101_v15 }
  0x53   :  { %159 = vmatmul.f32.vlgmr.msra.gmra.mxu0 %v127_v25 }
  0x90   :  { %v140_v28 = vpop.xlane.xlu1 %139  ;;  %v136_v31 = vpop.xlane.xlu0 %135 }
  0x98   :  { %v142_v37 = vpop.xlane.xlu1 %141  ;;  %v138_v44 = vpop.xlane.xlu0 %137 }
  0xd0   :  { %v160_v36 = vpop.f32.mrf.mxu0 }
  0xd1   :  { %v163_v41 = vperm.slane %v160_v36, 0 }
  0xd3   :  { %v167_v43 = vadd.f32 %v163_v41, %v142_v37  ;;  %v166_v45 = vadd.f32 %v163_v41, %v140_v28  ;;  %v164_v46 = vadd.f32 %v163_v41, %v136_v31  ;;  %v165_v52 = vadd.f32 %v163_v41, %v138_v44 }
  0xd5   :  { %v175_v50 = vmul.f32 0.2, %v167_v43  ;;  %vm171_vm1 = vcmp.ge.f32.partialorder %v167_v43, 0.0  ;;  %vm170_vm2 = vcmp.ge.f32.partialorder %v166_v45, 0.0  ;;  %v174_v53 = vmul.f32 0.2, %v166_v45 }
  0xd6   :  { %vm168_vm3 = vcmp.ge.f32.partialorder %v164_v46, 0.0  ;;  %v172_v54 = vmul.f32 0.2, %v164_v46  ;;  %v173_v62 = vmul.f32 0.2, %v165_v52  ;;  %vm169_vm4 = vcmp.ge.f32.partialorder %v165_v52, 0.0 }
  0xd7   :  { %v179_v55 = vsel %vm171_vm1, %v167_v43, %v175_v50  ;;  %v178_v57 = vsel %vm170_vm2, %v166_v45, %v174_v53 }
  0xd8   :  { %v191_v56 = vadd.f32 %v187_v47, %v179_v55  ;;  %v176_v58 = vsel %vm168_vm3, %v164_v46, %v172_v54  ;;  %v190_v59 = vadd.f32 %v186_v48, %v178_v57  ;;  %v177_v0 = vsel %vm169_vm4, %v165_v52, %v173_v62  ;;  %v256_v48 = vld [vmem:[#allocation3] sm:$0xff]  ;;  %v259_v52 = vld [vmem:[#allocation3 + $0x18] sm:$0xff] }
  0xd9   :  { %v188_v60 = vadd.f32 %v184_v51, %v176_v58  ;;  %v189_v1 = vadd.f32 %v185_v63, %v177_v0 }
  0xda   :  { %202 = vmax.xlane.f32.xlu1 %v191_v56  ;;  %200 = vmax.xlane.f32.xlu0 %v190_v59 }
  0xdb   :  { %196 = vmax.xlane.f32.xlu2 %v188_v60 }
  0xe3   :  { %198 = vmax.xlane.f32.xlu2 %v189_v1 }
 0x14d   :  { %v203_v7 = vpop.xlane.xlu1 %202  ;;  %v201_v10 = vpop.xlane.xlu0 %200 }
 0x14e   :  { %v207_v8 = vmax.f32 %v673_v4, %v203_v7  ;;  %v197_v9 = vpop.xlane.xlu2 %196  ;;  %v206_v12 = vmax.f32 %v194_v6, %v201_v10 }
 0x14f   :  { %v204_v11 = vmax.f32 %v192_v5, %v197_v9 }
 0x150   :  { %v211_v13 = vsub.f32 %v673_v4, %v207_v8  ;;  %349 = vst.msk [vmem:[#allocation2 + $0x18] sm:$0xff] %vm84_vm0, %v207_v8  ;;  %v210_v15 = vsub.f32 %v194_v6, %v206_v12  ;;  %232 = vperm.xlu1 %438, %v206_v12  }
 0x151   :  { %v208_v14 = vsub.f32 %v192_v5, %v204_v11  ;;  %346 = vst.msk [vmem:[#allocation2] sm:$0xff] %vm84_vm0, %v204_v11  ;;  %222 = vperm.xlu2 %436, %v204_v11  }
 0x152   :  { %348 = vst.msk [vmem:[#allocation2 + $0x10] sm:$0xff] %vm84_vm0, %v206_v12  ;;  %v218_v46 = vmul.f32 1.442695, %v211_v13 }
 0x153   :  { %v212_v45 = vmul.f32 1.442695, %v208_v14 }
 0x156   :  { %v199_v17 = vpop.xlane.xlu2 %198 }
 0x157   :  { %v205_v18 = vmax.f32 %v193_v16, %v199_v17 }
 0x159   :  { %v209_v19 = vsub.f32 %v193_v16, %v205_v18  ;;  %347 = vst.msk [vmem:[#allocation2 + $0x8] sm:$0xff] %vm84_vm0, %v205_v18  ;;  %227 = vperm.xlu0 %437, %v205_v18   ;;  %237 = vperm.xlu2 %436, %v207_v8  }
 0x15b   :  { %v214_v40 = vmul.f32 1.442695, %v209_v19 }
 0x1ab   :  { %v223_v20 = vpop.permute.xlu2 %222 }
 0x1ac   :  { %v240_v21 = vsub.f32 %v188_v60, %v223_v20  ;;  %v258_v60 = vld [vmem:[#allocation3 + $0x10] sm:$0xff] }
 0x1ae   :  { %v244_v22 = vmul.f32 1.442695, %v240_v21 }
 0x1b0   :  { %440 = vpow2.f32 %v244_v22 }
 0x1b3   :  { %v238_v23 = vpop.permute.xlu2 %237 }
 0x1b4   :  { %v243_v24 = vsub.f32 %v191_v56, %v238_v23 }
 0x1b6   :  { %v441_v25 = vpop.eup %440  ;;  %v250_v26 = vmul.f32 1.442695, %v243_v24 }
 0x1b7   :  { %v252_v27 = vmul.f32 %v441_v25, %v661_v35 }
 0x1b8   :  { %442 = vpow2.f32 %v250_v26 }
 0x1b9   :  { %264 = vadd.xlane.f32.xlu2 %v252_v27  ;;  %325 = vmatmul.f32.vlgmr.msra.gmra.mxu1 %v252_v27 }
 0x1be   :  { %v443_v28 = vpop.eup %442 }
 0x1bf   :  { %v255_v29 = vmul.f32 %v443_v28, %v657_v33  ;;  %v216_v33 = vmul.f32 1.442695, %v210_v15 }
 0x1c1   :  { %270 = vadd.xlane.f32.xlu2 %v255_v29 }
 0x1c2   :  { %v233_v30 = vpop.permute.xlu1 %232 }
 0x1c3   :  { %v242_v31 = vsub.f32 %v190_v59, %v233_v30 }
 0x1c5   :  { %v248_v32 = vmul.f32 1.442695, %v242_v31 }
 0x1c7   :  { %444 = vpow2.f32 %v248_v32 }
 0x1cb   :  { %v228_v36 = vpop.permute.xlu0 %227 }
 0x1cc   :  { %v241_v37 = vsub.f32 %v189_v1, %v228_v36 }
 0x1cd   :  { %v445_v38 = vpop.eup %444 }
 0x1ce   :  { %v246_v39 = vmul.f32 1.442695, %v241_v37  ;;  %v254_v41 = vmul.f32 %v445_v38, %v659_v34 }
 0x1d0   :  { %446 = vpow2.f32 %v246_v39  ;;  %268 = vadd.xlane.f32.xlu0 %v254_v41 }
 0x1d1   :  { %448 = vpow2.f32 %v214_v40 }
 0x1d2   :  { %450 = vpow2.f32 %v216_v33 }
 0x1d3   :  { %452 = vpow2.f32 %v212_v45 }
 0x1d4   :  { %454 = vpow2.f32 %v218_v46 }
 0x1d6   :  { %v447_v35 = vpop.eup %446 }
 0x1d7   :  { %v253_v42 = vmul.f32 %v447_v35, %v666_v49  ;;  %v449_v43 = vpop.eup %448 }
 0x1d8   :  { %v451_v44 = vpop.eup %450  ;;  %v261_v3 = vmul.f32 %v449_v43, %v257_v2 }
 0x1d9   :  { %266 = vadd.xlane.f32.xlu1 %v253_v42  ;;  %328 = vmatmul.f32.gmra.mxu1 %v253_v42  ;;  %v453_v34 = vpop.eup %452  ;;  %v262_v61 = vmul.f32 %v451_v44, %v258_v60 }
 0x1da   :  { %292 = vperm.xlu2 %436, %v449_v43   ;;  %v455_v47 = vpop.eup %454  ;;  %v260_v49 = vmul.f32 %v453_v34, %v256_v48 }
 0x1db   :  { %v263_v53 = vmul.f32 %v455_v47, %v259_v52 }
 0x1e1   :  { %331 = vmatmul.f32.gmra.mxu1 %v254_v41 }
 0x1e4   :  { %297 = vperm.xlu0 %437, %v451_v44  }
 0x1e9   :  { %334 = vmatmul.f32.gmra.mxu1 %v255_v29 }
 0x1f2   :  { %287 = vperm.xlu1 %438, %v453_v34  }
 0x1fa   :  { %302 = vperm.xlu1 %438, %v455_v47  }
 0x22c   :  { %v265_v50 = vpop.xlane.xlu2 %264 }
 0x22d   :  { %v272_v51 = vadd.f32 %v265_v50, %v260_v49 }
 0x22f   :  { %277 = vst.msk [vmem:[#allocation3] sm:$0xff] %vm84_vm0, %v272_v51 }
 0x234   :  { %v271_v54 = vpop.xlane.xlu2 %270 }
 0x235   :  { %v275_v55 = vadd.f32 %v271_v54, %v263_v53 }
 0x236   :  { %v353_v56 = vld [vmem:[#allocation3] sm:$0xff]  ;;  %v326_v12 = vpop.f32.mrf.mxu1 }
 0x237   :  { %280 = vst.msk [vmem:[#allocation3 + $0x18] sm:$0xff] %vm84_vm0, %v275_v55  ;;  %456 = vrcp.f32 %v353_v56  ;;  %vm357_vm5 = vcmp.gt.f32.partialorder %v353_v56, 0.0 }
 0x23c   :  { %v293_v15 = vpop.permute.xlu2 %292 }
 0x23d   :  { %v457_v57 = vpop.eup %456  ;;  %v306_v32 = vmul.f32 0.0, %v293_v15 }
 0x23e   :  { %v365_v58 = vsel %vm357_vm5, %v457_v57, 0.0  ;;  %v356_v59 = vld [vmem:[#allocation3 + $0x18] sm:$0xff] }
 0x23f   :  { %375 = vperm.xlu2 %436, %v365_v58   ;;  %458 = vrcp.f32 %v356_v59  ;;  %vm360_vm6 = vcmp.gt.f32.partialorder %v356_v59, 0.0 }
 0x243   :  { %v269_v62 = vpop.xlane.xlu0 %268 }
 0x244   :  { %v274_v0 = vadd.f32 %v269_v62, %v262_v61 }
 0x245   :  { %v459_v63 = vpop.eup %458 }
 0x246   :  { %v368_v1 = vsel %vm360_vm6, %v459_v63, 0.0  ;;  %279 = vst.msk [vmem:[#allocation3 + $0x10] sm:$0xff] %vm84_vm0, %v274_v0 }
 0x247   :  { %390 = vperm.xlu2 %436, %v368_v1  }
 0x24c   :  { %v267_v4 = vpop.xlane.xlu1 %266 }
 0x24d   :  { %v273_v5 = vadd.f32 %v267_v4, %v261_v3  ;;  %v355_v6 = vld [vmem:[#allocation3 + $0x10] sm:$0xff] }
 0x24e   :  { %460 = vrcp.f32 %v355_v6  ;;  %vm359_vm7 = vcmp.gt.f32.partialorder %v355_v6, 0.0 }
 0x24f   :  { %278 = vst.msk [vmem:[#allocation3 + $0x8] sm:$0xff] %vm84_vm0, %v273_v5 }
 0x254   :  { %v461_v7 = vpop.eup %460 }
 0x255   :  { %v367_v8 = vsel %vm359_vm7, %v461_v7, 0.0 }
 0x256   :  { %v354_v9 = vld [vmem:[#allocation3 + $0x8] sm:$0xff]  ;;  %385 = vperm.xlu0 %437, %v367_v8   ;;  %v329_v13 = vpop.f32.mrf.mxu1  ;;  %v298_v27 = vpop.permute.xlu0 %297 }
 0x257   :  { %462 = vrcp.f32 %v354_v9  ;;  %vm358_vm8 = vcmp.gt.f32.partialorder %v354_v9, 0.0  ;;  %v307_v28 = vmul.f32 0.0, %v298_v27  ;;  %v339_v36 = vadd.f32 %v329_v13, %v306_v32 }
 0x25d   :  { %v463_v10 = vpop.eup %462 }
 0x25e   :  { %v366_v11 = vsel %vm358_vm8, %v463_v10, 0.0  ;;  %v332_v17 = vpop.f32.mrf.mxu1 }
 0x25f   :  { %380 = vperm.xlu1 %438, %v366_v11   ;;  %v340_v29 = vadd.f32 %v332_v17, %v307_v28 }
 0x264   :  { %v288_v14 = vpop.permute.xlu1 %287 }
 0x265   :  { %v305_v16 = vmul.f32 0.0, %v288_v14 }
 0x266   :  { %v335_v23 = vpop.f32.mrf.mxu1 }
 0x267   :  { %v338_v18 = vadd.f32 %v326_v12, %v305_v16 }
 0x26c   :  { %v303_v19 = vpop.permute.xlu1 %302 }
 0x26d   :  { %v308_v22 = vmul.f32 0.0, %v303_v19 }
 0x26f   :  { %v341_v24 = vadd.f32 %v335_v23, %v308_v22 }
 0x299   :  { %v376_v20 = vpop.permute.xlu2 %375 }
 0x29a   :  { %v393_v21 = vmul.f32 %v376_v20, %v338_v18 }
 0x29c   :  { %397 = vst [vmem:[#allocation13] sm:$0xff] %v393_v21 }
 0x2a1   :  { %v391_v25 = vpop.permute.xlu2 %390 }
 0x2a2   :  { %v396_v26 = vmul.f32 %v391_v25, %v341_v24 }
 0x2a4   :  { %400 = vst [vmem:[#allocation13 + $0x18] sm:$0xff] %v396_v26 }
 0x2c8   :  { %v386_v30 = vpop.permute.xlu0 %385 }
 0x2c9   :  { %v395_v31 = vmul.f32 %v386_v30, %v340_v29 }
 0x2cb   :  { %399 = vst [vmem:[#allocation13 + $0x10] sm:$0xff] %v395_v31 }
 0x2d1   :  { %v381_v37 = vpop.permute.xlu1 %380 }
 0x2d2   :  { %v394_v38 = vmul.f32 %v381_v37, %v339_v36 }
 0x2d4   :  { %398 = vst [vmem:[#allocation13 + $0x8] sm:$0xff] %v394_v38 }
 0x2d5   :  { %413 = dma.vmem_to_hbm [thread:$0]  %s406_s13, 512, %s408_s16, [#allocation7], %s593_s26, %s593_s26, %s594_s27  }
 0x2d6   :  { %590 = dma.done.wait [#allocation7], 512  }
 0x2d7   :  { %591 = vsyncadd [#allocation7], 4294966784 }
 0x2d8   :  { %418 = vsyncpa [#allocation6], 1 }
 0x2d9   :  { %419 = vsyncpa [#allocation9], 1 }
 0x2da   :  { %420 = vsyncpa [#allocation12], 1 }
 0x2db   :  { %421 = vsyncpa [#allocation7], 1 }

</bundles_post_ra>
